<compile_context>
chip_gen: v5e
topology: v5e:2x2
jax: 0.10.0
libtpu: 0.0.40
codegen_flags: <defaults>
</compile_context>

<pallas_src>
import functools

import jax
import jax.numpy as jnp
from jax.experimental import pallas as pl
from jax.experimental.pallas import tpu as pltpu


def _pick_spatial_tile(S, C, max_block_bytes=4 << 20):
    """Largest multiple of 128 dividing S, capped so one (C, tS) f32 block is a
    few MiB (double-buffer friendly on every TPU generation)."""
    if S % 128 != 0:
        return S
    cap = max(128, (max_block_bytes // (4 * max(C, 1))) // 128 * 128)
    best = 128
    t = 128
    limit = min(S, cap)
    while t <= limit:
        if S % t == 0:
            best = t
        t += 128
    return best


def _channel_attn_kernel(x_ref, w1_ref, w2_ref, o_ref, sum_acc, max_acc, *, inv_s):
    # x_ref : VMEM (C, tS)   one lane-dense spatial tile of one batch element
    # w1_ref: VMEM (Ch, C)   fc1 weight (Conv2d(C, Ch, 1x1) squeezed)
    # w2_ref: VMEM (C, Ch)   fc2 weight (Conv2d(Ch, C, 1x1) squeezed)
    # o_ref : VMEM (C, 1)    sigmoid(channel attention) for this batch element
    # sum_acc, max_acc: VMEM (C, 1) f32 accumulators (persist across s steps)
    s = pl.program_id(1)

    @pl.when(s == 0)
    def _init():
        sum_acc[...] = jnp.zeros_like(sum_acc)
        max_acc[...] = jnp.full_like(max_acc, -jnp.inf)

    x = x_ref[...].astype(jnp.float32)                      # (C, tS)
    sum_acc[...] += jnp.sum(x, axis=-1, keepdims=True)      # (C, 1)
    max_acc[...] = jnp.maximum(max_acc[...],
                               jnp.max(x, axis=-1, keepdims=True))

    @pl.when(s == pl.num_programs(1) - 1)
    def _finalize():
        mean = sum_acc[...] * inv_s                         # (C, 1)
        mx = max_acc[...]                                   # (C, 1)
        w1 = w1_ref[...].astype(jnp.float32)                # (Ch, C)
        w2 = w2_ref[...].astype(jnp.float32)                # (C, Ch)

        def mlp(v):                                         # (C,1) -> (C,1)
            h = jnp.maximum(
                jnp.dot(w1, v, preferred_element_type=jnp.float32), 0.0)
            return jnp.dot(w2, h, preferred_element_type=jnp.float32)

        y = mlp(mean) + mlp(mx)
        o_ref[...] = jax.nn.sigmoid(y).astype(o_ref.dtype)


def channel_attention(x, w1, w2):
    """x: (N, C, H, W); w1: (C//16, C); w2: (C, C//16). Returns (N, C, 1, 1)."""
    N, C, H, W = x.shape
    Ch = w1.shape[0]
    assert w1.shape == (Ch, C) and w2.shape == (C, Ch)

    S = H * W
    x3 = x.reshape(N, C, S)          # contiguous reshape: no extra HBM traffic
    tS = _pick_spatial_tile(S, C)
    nS = S // tS

    kernel = functools.partial(_channel_attn_kernel, inv_s=1.0 / float(S))

    out = pl.pallas_call(
        kernel,
        out_shape=jax.ShapeDtypeStruct((N, C, 1), x.dtype),
        grid_spec=pltpu.PrefetchScalarGridSpec(
            num_scalar_prefetch=0,
            grid=(N, nS),
            in_specs=[
                pl.BlockSpec((pl.Squeezed(), C, tS), lambda n, s: (n, 0, s)),  # x
                pl.BlockSpec((Ch, C), lambda n, s: (0, 0)),                    # w1
                pl.BlockSpec((C, Ch), lambda n, s: (0, 0)),                    # w2
            ],
            out_specs=pl.BlockSpec((pl.Squeezed(), C, 1), lambda n, s: (n, 0, 0)),
            scratch_shapes=[pltpu.VMEM((C, 1), jnp.float32),   # running sum
                            pltpu.VMEM((C, 1), jnp.float32)],  # running max
        ),
        compiler_params=pltpu.CompilerParams(
            dimension_semantics=("parallel", "arbitrary")),
    )(x3, w1, w2)
    return out.reshape(N, C, 1, 1)


def _reference(x, w1, w2):
    # Pure-JAX reference for verification (high precision matmuls).
    avg = jnp.mean(x, axis=(2, 3))                          # (N, C)
    mx = jnp.max(x, axis=(2, 3))                            # (N, C)

    def mlp(v):
        h = jnp.maximum(
            jnp.dot(v, w1.T, precision=jax.lax.Precision.HIGHEST), 0.0)
        return jnp.dot(h, w2.T, precision=jax.lax.Precision.HIGHEST)

    y = mlp(avg) + mlp(mx)
    return jax.nn.sigmoid(y)[:, :, None, None]


if __name__ == "__main__":
    key = jax.random.PRNGKey(0)
    kx, k1, k2 = jax.random.split(key, 3)

    # The module uses in_planes // 16, so channels must be >= 16; pick 64.
    N, C, H, W = 2, 64, 16, 16
    Ch = C // 16

    x = jax.random.normal(kx, (N, C, H, W), dtype=jnp.float32)
    # Conv2d(C, Ch, 1x1, bias=False) and Conv2d(Ch, C, 1x1, bias=False) weights,
    # squeezed from (O, I, 1, 1) to 2D.
    fc1_w = (jax.random.uniform(k1, (Ch, C, 1, 1), dtype=jnp.float32) - 0.5) * 0.25
    fc2_w = (jax.random.uniform(k2, (C, Ch, 1, 1), dtype=jnp.float32) - 0.5) * 0.25
    w1 = fc1_w.reshape(Ch, C)
    w2 = fc2_w.reshape(C, Ch)

    out = channel_attention(x, w1, w2)
    jax.block_until_ready(out)

    ref = _reference(x, w1, w2)
    assert out.shape == (N, C, 1, 1)
    assert jnp.allclose(out, ref, atol=1e-4, rtol=1e-4), "mismatch vs reference"

    print("KERNEL_OK")
</pallas_src>

<mosaic_0001>
module attributes {stable_mosaic.version = 11 : i64} {
  func.func @_channel_attn_kernel(%arg0: i32, %arg1: i32, %arg2: memref<1x64x256xf32, #tpu.memory_space<vmem>>, %arg3: memref<4x64xf32, #tpu.memory_space<vmem>>, %arg4: memref<64x4xf32, #tpu.memory_space<vmem>>, %arg5: memref<1x64x1xf32, #tpu.memory_space<vmem>>, %arg6: memref<64x1xf32, #tpu.memory_space<vmem>>, %arg7: memref<64x1xf32, #tpu.memory_space<vmem>>) attributes {dimension_semantics = [#tpu.dimension_semantics<parallel>, #tpu.dimension_semantics<arbitrary>], iteration_bounds = array<i64: 2, 1>, scalar_prefetch = 0 : i64, scratch_operands = 2 : i64, tpu.core_type = #tpu.core_type<tc>, window_params = [{transform_indices = @transform_0, window_bounds = array<i64: 1, 64, 256>}, {pipeline_mode = #tpu.pipeline_mode<synchronous>, transform_indices = @transform_1, window_bounds = array<i64: 4, 64>}, {pipeline_mode = #tpu.pipeline_mode<synchronous>, transform_indices = @transform_2, window_bounds = array<i64: 64, 4>}, {transform_indices = @transform_3, window_bounds = array<i64: 1, 64, 1>}]} {
    %c0_i32 = arith.constant 0 : i32
    %0 = arith.cmpi eq, %arg1, %c0_i32 : i32
    %1 = arith.extui %0 : i1 to i32
    %c0_i32_0 = arith.constant 0 : i32
    %2 = arith.cmpi ne, %1, %c0_i32_0 : i32
    scf.if %2 {
      %cst_14 = arith.constant 0.000000e+00 : f32
      %18 = vector.broadcast %cst_14 : f32 to vector<64x1xf32>
      %c0_15 = arith.constant 0 : index
      %c0_16 = arith.constant 0 : index
      %19 = vector.load %arg6[%c0_15, %c0_16] : memref<64x1xf32, #tpu.memory_space<vmem>>, vector<64x1xf32>
      tpu.vector_store %arg6[%c0_15, %c0_16], %18 {strides = array<i32>} : memref<64x1xf32, #tpu.memory_space<vmem>>, vector<64x1xf32>,
      %cst_17 = arith.constant 0xFF800000 : f32
      %20 = vector.broadcast %cst_17 : f32 to vector<64x1xf32>
      %c0_18 = arith.constant 0 : index
      %c0_19 = arith.constant 0 : index
      %21 = vector.load %arg7[%c0_18, %c0_19] : memref<64x1xf32, #tpu.memory_space<vmem>>, vector<64x1xf32>
      tpu.vector_store %arg7[%c0_18, %c0_19], %20 {strides = array<i32>} : memref<64x1xf32, #tpu.memory_space<vmem>>, vector<64x1xf32>,
    } else {
    }
    %c0 = arith.constant 0 : index
    %c0_1 = arith.constant 0 : index
    %c0_2 = arith.constant 0 : index
    %3 = vector.load %arg2[%c0, %c0_1, %c0_2] : memref<1x64x256xf32, #tpu.memory_space<vmem>>, vector<1x64x256xf32>
    %4 = vector.shape_cast %3 : vector<1x64x256xf32> to vector<64x256xf32>
    %c0_3 = arith.constant 0 : index
    %c0_4 = arith.constant 0 : index
    %5 = vector.load %arg6[%c0_3, %c0_4] : memref<64x1xf32, #tpu.memory_space<vmem>>, vector<64x1xf32>
    %cst = arith.constant dense<0.000000e+00> : vector<64xf32>
    %6 = vector.multi_reduction <add>, %4, %cst [1] : vector<64x256xf32> to vector<64xf32>
    %7 = vector.shape_cast %6 : vector<64xf32> to vector<64x1xf32>
    %8 = arith.addf %5, %7 : vector<64x1xf32>
    %c0_5 = arith.constant 0 : index
    %c0_6 = arith.constant 0 : index
    %9 = vector.load %arg6[%c0_5, %c0_6] : memref<64x1xf32, #tpu.memory_space<vmem>>, vector<64x1xf32>
    tpu.vector_store %arg6[%c0_5, %c0_6], %8 {strides = array<i32>} : memref<64x1xf32, #tpu.memory_space<vmem>>, vector<64x1xf32>,
    %c0_7 = arith.constant 0 : index
    %c0_8 = arith.constant 0 : index
    %10 = vector.load %arg7[%c0_7, %c0_8] : memref<64x1xf32, #tpu.memory_space<vmem>>, vector<64x1xf32>
    %cst_9 = arith.constant dense<0xFF800000> : vector<64xf32>
    %11 = vector.multi_reduction <maximumf>, %4, %cst_9 [1] : vector<64x256xf32> to vector<64xf32>
    %12 = vector.shape_cast %11 : vector<64xf32> to vector<64x1xf32>
    %13 = arith.maximumf %10, %12 : vector<64x1xf32>
    %c0_10 = arith.constant 0 : index
    %c0_11 = arith.constant 0 : index
    %14 = vector.load %arg7[%c0_10, %c0_11] : memref<64x1xf32, #tpu.memory_space<vmem>>, vector<64x1xf32>
    tpu.vector_store %arg7[%c0_10, %c0_11], %13 {strides = array<i32>} : memref<64x1xf32, #tpu.memory_space<vmem>>, vector<64x1xf32>,
    %c0_i32_12 = arith.constant 0 : i32
    %15 = arith.cmpi eq, %arg1, %c0_i32_12 : i32
    %16 = arith.extui %15 : i1 to i32
    %c0_i32_13 = arith.constant 0 : i32
    %17 = arith.cmpi ne, %16, %c0_i32_13 : i32
    scf.if %17 {
      %c0_14 = arith.constant 0 : index
      %c0_15 = arith.constant 0 : index
      %18 = vector.load %arg6[%c0_14, %c0_15] : memref<64x1xf32, #tpu.memory_space<vmem>>, vector<64x1xf32>
      %cst_16 = arith.constant 3.906250e-03 : f32
      %19 = vector.broadcast %cst_16 : f32 to vector<64x1xf32>
      %20 = arith.mulf %18, %19 : vector<64x1xf32>
      %c0_17 = arith.constant 0 : index
      %c0_18 = arith.constant 0 : index
      %21 = vector.load %arg7[%c0_17, %c0_18] : memref<64x1xf32, #tpu.memory_space<vmem>>, vector<64x1xf32>
      %c0_19 = arith.constant 0 : index
      %c0_20 = arith.constant 0 : index
      %22 = vector.load %arg3[%c0_19, %c0_20] : memref<4x64xf32, #tpu.memory_space<vmem>>, vector<4x64xf32>
      %c0_21 = arith.constant 0 : index
      %c0_22 = arith.constant 0 : index
      %23 = vector.load %arg4[%c0_21, %c0_22] : memref<64x4xf32, #tpu.memory_space<vmem>>, vector<64x4xf32>
      %cst_23 = arith.constant dense<0.000000e+00> : vector<4x1xf32>
      %24 = tpu.matmul %22, %20, %cst_23 {dimension_numbers = #tpu.dot_dimension_numbers<[1], [0], [0], [1], [0, 0, 1, 1], [], []>} : vector<4x64xf32>, vector<64x1xf32>, vector<4x1xf32> -> vector<4x1xf32>
      %cst_24 = arith.constant 0.000000e+00 : f32
      %25 = vector.broadcast %cst_24 : f32 to vector<4x1xf32>
      %26 = arith.maximumf %24, %25 : vector<4x1xf32>
      %cst_25 = arith.constant dense<0.000000e+00> : vector<64x1xf32>
      %27 = tpu.matmul %23, %26, %cst_25 {dimension_numbers = #tpu.dot_dimension_numbers<[1], [0], [0], [1], [0, 0, 1, 1], [], []>} : vector<64x4xf32>, vector<4x1xf32>, vector<64x1xf32> -> vector<64x1xf32>
      %cst_26 = arith.constant dense<0.000000e+00> : vector<4x1xf32>
      %28 = tpu.matmul %22, %21, %cst_26 {dimension_numbers = #tpu.dot_dimension_numbers<[1], [0], [0], [1], [0, 0, 1, 1], [], []>} : vector<4x64xf32>, vector<64x1xf32>, vector<4x1xf32> -> vector<4x1xf32>
      %cst_27 = arith.constant 0.000000e+00 : f32
      %29 = vector.broadcast %cst_27 : f32 to vector<4x1xf32>
      %30 = arith.maximumf %28, %29 : vector<4x1xf32>
      %cst_28 = arith.constant dense<0.000000e+00> : vector<64x1xf32>
      %31 = tpu.matmul %23, %30, %cst_28 {dimension_numbers = #tpu.dot_dimension_numbers<[1], [0], [0], [1], [0, 0, 1, 1], [], []>} : vector<64x4xf32>, vector<4x1xf32>, vector<64x1xf32> -> vector<64x1xf32>
      %32 = arith.addf %27, %31 : vector<64x1xf32>
      %33 = arith.negf %32 : vector<64x1xf32>
      %34 = math.exp %33 : vector<64x1xf32>
      %cst_29 = arith.constant 1.000000e+00 : f32
      %35 = vector.broadcast %cst_29 : f32 to vector<64x1xf32>
      %36 = arith.addf %35, %34 : vector<64x1xf32>
      %37 = arith.divf %35, %36 : vector<64x1xf32>
      %c0_30 = arith.constant 0 : index
      %c0_31 = arith.constant 0 : index
      %c0_32 = arith.constant 0 : index
      %38 = vector.load %arg5[%c0_30, %c0_31, %c0_32] : memref<1x64x1xf32, #tpu.memory_space<vmem>>, vector<1x64x1xf32>
      %39 = vector.shape_cast %38 : vector<1x64x1xf32> to vector<64x1xf32>
      %40 = vector.shape_cast %37 : vector<64x1xf32> to vector<1x64x1xf32>
      tpu.vector_store %arg5[%c0_30, %c0_31, %c0_32], %40 {strides = array<i32>} : memref<1x64x1xf32, #tpu.memory_space<vmem>>, vector<1x64x1xf32>,
    } else {
    }
    return
  }
  func.func @transform_0(%arg0: i32, %arg1: i32) -> (i32, i32, i32) {
    %c0_i32 = arith.constant 0 : i32
    %c0_i32_0 = arith.constant 0 : i32
    return %arg0, %c0_i32, %arg1 : i32, i32, i32
  }
  func.func @transform_1(%arg0: i32, %arg1: i32) -> (i32, i32) {
    %c0_i32 = arith.constant 0 : i32
    %c0_i32_0 = arith.constant 0 : i32
    %c0_i32_1 = arith.constant 0 : i32
    return %c0_i32, %c0_i32_0 : i32, i32
  }
  func.func @transform_2(%arg0: i32, %arg1: i32) -> (i32, i32) {
    %c0_i32 = arith.constant 0 : i32
    %c0_i32_0 = arith.constant 0 : i32
    %c0_i32_1 = arith.constant 0 : i32
    return %c0_i32, %c0_i32_0 : i32, i32
  }
  func.func @transform_3(%arg0: i32, %arg1: i32) -> (i32, i32, i32) {
    %c0_i32 = arith.constant 0 : i32
    %c0_i32_0 = arith.constant 0 : i32
    %c0_i32_1 = arith.constant 0 : i32
    return %arg0, %c0_i32, %c0_i32_0 : i32, i32, i32
  }
}

</mosaic_0001>

<bundles_post_ra>
// kernel: tpu_custom_call.1
= control target key start
LH: loop header
LB: loop body
LE: loop exit
PB: predicated region body
PF: predicated region fallthrough
CT: control target
= control target key end

     0   :  { %8 = vsyncpa [#allocation5], 0  ;;  %s1251_s0 = inlined_call_operand.hbm [shape: f32[2,64,256], index: 0, kind: input, shape index: {}]   ;;  %s1252_s1 = inlined_call_operand.vmem [shape: f32[4,64], index: 1, kind: input, shape index: {}]   ;;  %s1253_s2 = inlined_call_operand.vmem [shape: f32[64,4], index: 2, kind: input, shape index: {}]   ;;  %s1254_s3 = inlined_call_operand.vmem [shape: f32[2,64,1], index: 3, kind: output, shape index: {}]  }
   0x1   :  { %10 = vsyncpa [#allocation5 + $0x1], 0  ;;  %s1020_s12 = smov 0   ;;  %s1022_s13 = smov 0  }
   0x2   :  { %s1024_s14 = smov 0   ;;  %s1026_s15 = smov 0  }
   0x3   :  { %s1028_s16 = smov 0   ;;  %s1030_s17 = smov 0  }
   0x4 LB: > { %s778_s18 = sadd.s32 4294967295, %s994_s17   ;;  %s28_s19 = sadd.s32 1, %s990_s16  ;;  %s994_s17 = sphi %s1030_s17, %s16_s17   ;;  %s990_s16 = sphi %s1028_s16, %s1269_s16   ;;  %s986_s15 = sphi %s1026_s15, %s1268_s15   ;;  %s982_s14 = sphi %s1024_s14, %s1267_s14   ;;  %s978_s13 = sphi %s1022_s13, %s1266_s13   ;;  %s974_s12 = sphi %s1020_s12, %s1265_s12  }
   0x5   : > { %p30_p0 = scmp.ge.s32.totalorder %s28_s19, 2  ;;  %s37_s20 = sadd.s32 1, %s982_s14 }
   0x6   : > { %p44_p1 = scmp.ne.s32.totalorder %s982_s14, %s978_s13  ;;  %p45_p2 = scmp.eq.s32.totalorder %s994_s17, 0 }
   0x7   : > { %s1271_s19 = smov (%p30_p0, %s28_s19), 0  ;;  %p50_p4 = scmp.ne.s32.totalorder %s978_s13, %s974_s12 }
   0x8   : > { %p1056_p3 = por %p45_p2, %p44_p1  ;;  %s32_s22 = ssub.s32 %s990_s16, %s1271_s19 }
   0x9   : > { %p51_p5 = scmp.eq.s32.totalorder %s778_s18, 0  ;;  %p35_p6 = scmp.eq.s32.totalorder %s32_s22, 0 }
   0xa   : > { %p829_p8 = scmp.lt.s32.totalorder %s994_s17, 2  ;;  %s148_s25 = sand.u32 1, %s982_s14  }
   0xb   : > { %p1063_p7 = por %p51_p5, %p50_p4  ;;  %s819_s26 = sshll.u32 %s990_s16, 7 }
   0xc   : > { %s1069_s24 = scalar_select %p35_p6, %s982_s14, %s37_s20  }
   0xd   : > { %s782_s27 = sshll.u32 %s148_s25, 7  ;;  %s159_s30 = scalar_lea.hbm %s1251_s0, %s819_s26 }
   0xe   : > { %s160_s4 = sshll.u32 %s159_s30, 4  ;;  %s152_s5 = scalar_lea.vmem [#allocation4], %s782_s27  ;;  %s161_s4 = int_to_ptr.hbm [resolvable:$true] %s160_s4 }
   0xf   : > { %s162_s6 = sshll.u32 %s152_s5, 4  ;;  %p826_p9 = pnand %p829_p8, %p1056_p3  ;;  %s163_s6 = int_to_ptr.vmem [resolvable:$true] %s162_s6 }
  0x10   : > { %p785_p10 = scmp.ge.s32.totalorder %s994_s17, 1  ;;  %p170_p11 = scmp.lt.s32.totalorder %s994_s17, 3 }
  0x11   : > { %s149_s7 = scalar_lea.sflag [#allocation5], %s148_s25  ;;  %s996_s8 = smov 256  }
  0x12   : > { %s997_s9 = smov 16   ;;  %p171_p12 = pnand %p785_p10, %p170_p11 }
  0x13   : > { %828 = dma.hbm_to_vmem [thread:$0]  (!%p826_p9), %s161_s4, 2048, %s163_s6, %s149_s7, %s996_s8, %s996_s8, %s997_s9  }
  0x14   : > { %174 = sbr.rel (%p171_p12) target bundleno = 528 (0x210), region = 32  ;;  %s176_s10 = sand.u32 (!%p171_p12), 1, %s978_s13  }
  0x15   : > { %s786_s11 = sshll.u32 (!%p171_p12), %s176_s10, 7  ;;  %s177_s12 = scalar_lea.sflag (!%p171_p12), [#allocation5], %s176_s10 }
  0x16   : > { %s1081_s18 = scalar_lea.vmem (!%p171_p12), [#allocation4], %s786_s11 }
  0x19   : > { %969 = dma.done.wait (%p1063_p7), %s177_s12, 2048  }
  0x1a   : > { %971 = vsyncadd (%p1063_p7), %s177_s12, 4294965248  ;;  %v245_v0 = vld [vmem:[%s1081_s18 + $0x70] sm:$0xff]  ;;  %v246_v1 = vld [vmem:[%s1081_s18 + $0x78] sm:$0xff]  ;;  %vm214_vm0 = vcmask 7168   ;;  %v998_v16 = vmov 0.0   ;;  %v999_v33 = vmov -inf  }
  0x1b   : > { %v243_v2 = vld [vmem:[%s1081_s18 + $0x60] sm:$0xff]  ;;  %v276_v3 = vadd.f32 %v246_v1, %v245_v0  ;;  %v325_v4 = vmax.f32 %v245_v0, %v246_v1  ;;  %v244_v5 = vld [vmem:[%s1081_s18 + $0x68] sm:$0xff]  ;;  %v241_v7 = vld [vmem:[%s1081_s18 + $0x50] sm:$0xff]  ;;  %222 = vst.msk [vmem:[#allocation2 + $0x38] sm:$0xff] %vm214_vm0, %v998_v16  ;;  %vm380_vm1 = vcmask 523264   ;;  %vm451_vm2 = vcmask 1043456  }
  0x1c   : > { %v322_v6 = vmax.f32 %v243_v2, %v244_v5  ;;  %v242_v8 = vld [vmem:[%s1081_s18 + $0x58] sm:$0xff]  ;;  %v239_v9 = vld [vmem:[%s1081_s18 + $0x40] sm:$0xff]  ;;  %v240_v10 = vld [vmem:[%s1081_s18 + $0x48] sm:$0xff]  ;;  %v273_v11 = vadd.f32 %v244_v5, %v243_v2  ;;  %215 = vst.msk [vmem:[#allocation2] sm:$0xff] %vm214_vm0, %v998_v16  ;;  %vm426_vm3 = vcmask 31744   ;;  %p205_p13 = scmp.lt.s32.totalorder %s986_s15, 1 }
  0x1d   : > { %277 = vadd.xlane.f32.xlu0 %v276_v3  ;;  %326 = vmax.xlane.f32.xlu1 %v325_v4  ;;  %v270_v12 = vadd.f32 %v242_v8, %v241_v7  ;;  %v267_v13 = vadd.f32 %v240_v10, %v239_v9  ;;  %v237_v14 = vld [vmem:[%s1081_s18 + $0x30] sm:$0xff]  ;;  %v238_v15 = vld [vmem:[%s1081_s18 + $0x38] sm:$0xff]  ;;  %216 = vst.msk [vmem:[#allocation2 + $0x8] sm:$0xff] %vm214_vm0, %v998_v16  ;;  %v235_v20 = vld [vmem:[%s1081_s18 + $0x20] sm:$0xff] }
  0x1e   : > { %323 = vmax.xlane.f32.xlu2 %v322_v6  ;;  %v319_v17 = vmax.f32 %v241_v7, %v242_v8  ;;  %v264_v18 = vadd.f32 %v238_v15, %v237_v14  ;;  %217 = vst.msk [vmem:[#allocation2 + $0x10] sm:$0xff] %vm214_vm0, %v998_v16  ;;  %v316_v19 = vmax.f32 %v239_v9, %v240_v10  ;;  %v236_v21 = vld [vmem:[%s1081_s18 + $0x28] sm:$0xff]  ;;  %v233_v22 = vld [vmem:[%s1081_s18 + $0x10] sm:$0xff]  ;;  %v234_v23 = vld [vmem:[%s1081_s18 + $0x18] sm:$0xff]  ;;  %s1273_s15 = smov (!%p205_p13, %s986_s15), 1 }
  0x1f   : > { %218 = vst.msk [vmem:[#allocation2 + $0x18] sm:$0xff] %vm214_vm0, %v998_v16  ;;  %v261_v24 = vadd.f32 %v236_v21, %v235_v20  ;;  %v313_v25 = vmax.f32 %v237_v14, %v238_v15  ;;  %v258_v26 = vadd.f32 %v234_v23, %v233_v22  ;;  %v231_v27 = vld [vmem:[%s1081_s18] sm:$0xff]  ;;  %v232_v28 = vld [vmem:[%s1081_s18 + $0x8] sm:$0xff]  ;;  %v310_v29 = vmax.f32 %v235_v20, %v236_v21  ;;  %s820_s12 = sshll.u32 %s1273_s15, 6 }
  0x20   : > { %219 = vst.msk [vmem:[#allocation2 + $0x20] sm:$0xff] %vm214_vm0, %v998_v16  ;;  %v255_v30 = vadd.f32 %v232_v28, %v231_v27  ;;  %v307_v31 = vmax.f32 %v233_v22, %v234_v23  ;;  %v304_v32 = vmax.f32 %v231_v27, %v232_v28  ;;  %s1192_s21 = scalar_lea.vmem %s1254_s3, %s820_s12 }
  0x21   : > { %220 = vst.msk [vmem:[#allocation2 + $0x28] sm:$0xff] %vm214_vm0, %v998_v16 }
  0x22   : > { %221 = vst.msk [vmem:[#allocation2 + $0x30] sm:$0xff] %vm214_vm0, %v998_v16  ;;  %v254_v34 = vld [vmem:[#allocation2 + $0x38] sm:$0xff] }
  0x23   : > { %230 = vst.msk [vmem:[#allocation3 + $0x38] sm:$0xff] %vm214_vm0, %v999_v33  ;;  %v247_v21 = vld [vmem:[#allocation2] sm:$0xff] }
  0x24   : > { %223 = vst.msk [vmem:[#allocation3] sm:$0xff] %vm214_vm0, %v999_v33  ;;  %v248_v9 = vld [vmem:[#allocation2 + $0x8] sm:$0xff] }
  0x25   : > { %274 = vadd.xlane.f32.xlu0 %v273_v11  ;;  %271 = vadd.xlane.f32.xlu1 %v270_v12  ;;  %224 = vst.msk [vmem:[#allocation3 + $0x8] sm:$0xff] %vm214_vm0, %v999_v33  ;;  %v249_v7 = vld [vmem:[#allocation2 + $0x10] sm:$0xff] }
  0x26   : > { %268 = vadd.xlane.f32.xlu2 %v267_v13  ;;  %225 = vst.msk [vmem:[#allocation3 + $0x10] sm:$0xff] %vm214_vm0, %v999_v33  ;;  %v250_v57 = vld [vmem:[#allocation2 + $0x18] sm:$0xff] }
  0x27   : > { %226 = vst.msk [vmem:[#allocation3 + $0x18] sm:$0xff] %vm214_vm0, %v999_v33  ;;  %v251_v45 = vld [vmem:[#allocation2 + $0x20] sm:$0xff] }
  0x28   : > { %227 = vst.msk [vmem:[#allocation3 + $0x20] sm:$0xff] %vm214_vm0, %v999_v33  ;;  %v252_v44 = vld [vmem:[#allocation2 + $0x28] sm:$0xff] }
  0x29   : > { %228 = vst.msk [vmem:[#allocation3 + $0x28] sm:$0xff] %vm214_vm0, %v999_v33  ;;  %v253_v43 = vld [vmem:[#allocation2 + $0x30] sm:$0xff] }
  0x2a   : > { %229 = vst.msk [vmem:[#allocation3 + $0x30] sm:$0xff] %vm214_vm0, %v999_v33  ;;  %v303_v35 = vld [vmem:[#allocation3 + $0x38] sm:$0xff] }
  0x2c   : > { %v297_v22 = vld [vmem:[#allocation3 + $0x8] sm:$0xff] }
  0x2d   : > { %320 = vmax.xlane.f32.xlu0 %v319_v17  ;;  %265 = vadd.xlane.f32.xlu1 %v264_v18  ;;  %v298_v20 = vld [vmem:[#allocation3 + $0x10] sm:$0xff] }
  0x2e   : > { %317 = vmax.xlane.f32.xlu2 %v316_v19  ;;  %v299_v8 = vld [vmem:[#allocation3 + $0x18] sm:$0xff] }
  0x2f   : > { %v300_v58 = vld [vmem:[#allocation3 + $0x20] sm:$0xff] }
  0x30   : > { %v301_v56 = vld [vmem:[#allocation3 + $0x28] sm:$0xff] }
  0x31   : > { %v302_v36 = vld [vmem:[#allocation3 + $0x30] sm:$0xff] }
  0x35   : > { %262 = vadd.xlane.f32.xlu0 %v261_v24  ;;  %314 = vmax.xlane.f32.xlu1 %v313_v25 }
  0x36   : > { %259 = vadd.xlane.f32.xlu2 %v258_v26 }
  0x3d   : > { %311 = vmax.xlane.f32.xlu0 %v310_v29  ;;  %256 = vadd.xlane.f32.xlu1 %v255_v30 }
  0x3e   : > { %308 = vmax.xlane.f32.xlu2 %v307_v31 }
  0x45   : > { %305 = vmax.xlane.f32.xlu0 %v304_v32 }
  0x90   : > { %v278_v37 = vpop.xlane.xlu0 %277  ;;  %v327_v38 = vpop.xlane.xlu1 %326 }
  0x91   : > { %v286_v39 = vadd.f32 %v278_v37, %v254_v34  ;;  %v335_v40 = vmax.f32 %v303_v35, %v327_v38  ;;  %v324_v41 = vpop.xlane.xlu2 %323  ;;  %v296_v34 = vld [vmem:[#allocation3] sm:$0xff] }
  0x92   : > { %v334_v42 = vmax.f32 %v302_v36, %v324_v41  ;;  %v371_v41 = vld [vmem:[%s1252_s1] sm:$0xf] }
  0x93   : > { %295 = vst.msk [vmem:[#allocation2 + $0x38] sm:$0xff] %vm214_vm0, %v286_v39 }
  0x94   : > { %343 = vst.msk [vmem:[#allocation3 + $0x38] sm:$0xff] %vm214_vm0, %v335_v40 }
  0x95   : > { %342 = vst.msk [vmem:[#allocation3 + $0x30] sm:$0xff] %vm214_vm0, %v334_v42 }
  0x98   : > { %v275_v46 = vpop.xlane.xlu0 %274  ;;  %v272_v47 = vpop.xlane.xlu1 %271 }
  0x99   : > { %v285_v48 = vadd.f32 %v275_v46, %v253_v43  ;;  %v284_v49 = vadd.f32 %v272_v47, %v252_v44  ;;  %v269_v50 = vpop.xlane.xlu2 %268  ;;  %v372_v46 = vld [vmem:[%s1253_s2] sm:$0xff] }
  0x9a   : > { %v354_v51 = vld [vmem:[#allocation2 + $0x38] sm:$0xff]  ;;  %v283_v52 = vadd.f32 %v269_v50, %v251_v45  ;;  %v374_v45 = vld [vmem:[%s1253_s2 + $0x10] sm:$0xff]  ;;  %v373_v50 = vld [vmem:[%s1253_s2 + $0x8] sm:$0xff] }
  0x9b   : > { %294 = vst.msk [vmem:[#allocation2 + $0x30] sm:$0xff] %vm214_vm0, %v285_v48  ;;  %v362_v53 = vmul.f32 0.00390625, %v354_v51  ;;  %v370_v54 = vld [vmem:[#allocation3 + $0x38] sm:$0xff]  ;;  %v376_v51 = vld [vmem:[%s1253_s2 + $0x20] sm:$0xff] }
  0x9c   : > { %293 = vst.msk [vmem:[#allocation2 + $0x28] sm:$0xff] %vm214_vm0, %v284_v49  ;;  %413 = vmatpush.msra.mxu1 %v370_v54  ;;  %v369_v55 = vld [vmem:[#allocation3 + $0x30] sm:$0xff]  ;;  %v375_v49 = vld [vmem:[%s1253_s2 + $0x18] sm:$0xff] }
  0x9d   : > { %392 = vmatpush.msra.mxu0 %v362_v53  ;;  %292 = vst.msk [vmem:[#allocation2 + $0x20] sm:$0xff] %vm214_vm0, %v283_v52  ;;  %v377_v52 = vld [vmem:[%s1253_s2 + $0x28] sm:$0xff]  ;;  %v378_v53 = vld [vmem:[%s1253_s2 + $0x30] sm:$0xff]  ;;  %v379_v54 = vld [vmem:[%s1253_s2 + $0x38] sm:$0xff] }
  0x9e   : > { %414 = vmatpush.msra.mxu1 %v369_v55 }
  0xa0   : > { %v321_v59 = vpop.xlane.xlu0 %320  ;;  %v266_v60 = vpop.xlane.xlu1 %265 }
  0xa1   : > { %v333_v61 = vmax.f32 %v301_v56, %v321_v59  ;;  %v318_v62 = vpop.xlane.xlu2 %317  ;;  %v282_v63 = vadd.f32 %v266_v60, %v250_v57 }
  0xa2   : > { %v353_v0 = vld [vmem:[#allocation2 + $0x30] sm:$0xff]  ;;  %v332_v1 = vmax.f32 %v300_v58, %v318_v62 }
  0xa3   : > { %341 = vst.msk [vmem:[#allocation3 + $0x28] sm:$0xff] %vm214_vm0, %v333_v61  ;;  %v361_v2 = vmul.f32 0.00390625, %v353_v0  ;;  %v352_v3 = vld [vmem:[#allocation2 + $0x28] sm:$0xff] }
  0xa4   : > { %340 = vst.msk [vmem:[#allocation3 + $0x20] sm:$0xff] %vm214_vm0, %v332_v1  ;;  %v360_v4 = vmul.f32 0.00390625, %v352_v3  ;;  %v351_v5 = vld [vmem:[#allocation2 + $0x20] sm:$0xff] }
  0xa5   : > { %393 = vmatpush.msra.mxu0 %v361_v2  ;;  %291 = vst.msk [vmem:[#allocation2 + $0x18] sm:$0xff] %vm214_vm0, %v282_v63  ;;  %v359_v6 = vmul.f32 0.00390625, %v351_v5 }
  0xa7   : > { %394 = vmatpush.msra.mxu0 %v360_v4 }
  0xa8   : > { %v263_v10 = vpop.xlane.xlu0 %262  ;;  %v315_v11 = vpop.xlane.xlu1 %314 }
  0xa9   : > { %v281_v12 = vadd.f32 %v263_v10, %v249_v7  ;;  %395 = vmatpush.msra.mxu0 %v359_v6  ;;  %v331_v13 = vmax.f32 %v299_v8, %v315_v11  ;;  %v260_v14 = vpop.xlane.xlu2 %259 }
  0xaa   : > { %v368_v15 = vld [vmem:[#allocation3 + $0x28] sm:$0xff]  ;;  %v280_v16 = vadd.f32 %v260_v14, %v248_v9 }
  0xab   : > { %290 = vst.msk [vmem:[#allocation2 + $0x10] sm:$0xff] %vm214_vm0, %v281_v12  ;;  %415 = vmatpush.msra.mxu1 %v368_v15  ;;  %v367_v17 = vld [vmem:[#allocation3 + $0x20] sm:$0xff] }
  0xac   : > { %339 = vst.msk [vmem:[#allocation3 + $0x18] sm:$0xff] %vm214_vm0, %v331_v13  ;;  %v350_v18 = vld [vmem:[#allocation2 + $0x18] sm:$0xff] }
  0xad   : > { %289 = vst.msk [vmem:[#allocation2 + $0x8] sm:$0xff] %vm214_vm0, %v280_v16  ;;  %416 = vmatpush.msra.mxu1 %v367_v17  ;;  %v358_v19 = vmul.f32 0.00390625, %v350_v18 }
  0xaf   : > { %396 = vmatpush.msra.mxu0 %v358_v19 }
  0xb0   : > { %v312_v23 = vpop.xlane.xlu0 %311  ;;  %v257_v24 = vpop.xlane.xlu1 %256 }
  0xb1   : > { %v330_v25 = vmax.f32 %v298_v20, %v312_v23  ;;  %v309_v26 = vpop.xlane.xlu2 %308  ;;  %v279_v27 = vadd.f32 %v257_v24, %v247_v21 }
  0xb2   : > { %v349_v28 = vld [vmem:[#allocation2 + $0x10] sm:$0xff]  ;;  %v329_v29 = vmax.f32 %v297_v22, %v309_v26 }
  0xb3   : > { %338 = vst.msk [vmem:[#allocation3 + $0x10] sm:$0xff] %vm214_vm0, %v330_v25  ;;  %v357_v30 = vmul.f32 0.00390625, %v349_v28  ;;  %v366_v31 = vld [vmem:[#allocation3 + $0x18] sm:$0xff] }
  0xb4   : > { %337 = vst.msk [vmem:[#allocation3 + $0x8] sm:$0xff] %vm214_vm0, %v329_v29  ;;  %417 = vmatpush.msra.mxu1 %v366_v31  ;;  %v348_v32 = vld [vmem:[#allocation2 + $0x8] sm:$0xff] }
  0xb5   : > { %397 = vmatpush.msra.mxu0 %v357_v30  ;;  %288 = vst.msk [vmem:[#allocation2] sm:$0xff] %vm214_vm0, %v279_v27  ;;  %v356_v33 = vmul.f32 0.00390625, %v348_v32 }
  0xb7   : > { %398 = vmatpush.msra.mxu0 %v356_v33 }
  0xb8   : > { %v306_v35 = vpop.xlane.xlu0 %305 }
  0xb9   : > { %v328_v36 = vmax.f32 %v296_v34, %v306_v35 }
  0xba   : > { %v365_v37 = vld [vmem:[#allocation3 + $0x10] sm:$0xff] }
  0xbb   : > { %336 = vst.msk [vmem:[#allocation3] sm:$0xff] %vm214_vm0, %v328_v36  ;;  %418 = vmatpush.msra.mxu1 %v365_v37  ;;  %v364_v38 = vld [vmem:[#allocation3 + $0x8] sm:$0xff] }
  0xbc   : > { %v347_v39 = vld [vmem:[#allocation2] sm:$0xff] }
  0xbd   : > { %419 = vmatpush.msra.mxu1 %v364_v38  ;;  %v355_v40 = vmul.f32 0.00390625, %v347_v39 }
  0xbf   : > { %399 = vmatpush.msra.mxu0 %v355_v40 }
  0xc0   : > { %789 = vmatmul.msk.f32.vlgmr.msra.gmra.mxu0 %vm380_vm1, %v371_v41 }
  0xc2   : > { %v363_v42 = vld [vmem:[#allocation3] sm:$0xff] }
  0xc3   : > { %420 = vmatpush.msra.mxu1 %v363_v42 }
  0xc4   : > { %790 = vmatmul.msk.f32.vlgmr.msra.gmra.mxu1 %vm380_vm1, %v371_v41 }
 0x13d   : > { %v401_v43 = vpop.f32.mrf.mxu0 }
 0x13e   : > { %v404_v44 = vmax.f32 %v401_v43, 0.0 }
 0x140   : > { %800 = vmatpush.msk.msrb.mxu1 %vm451_vm2, %v404_v44  ;;  %822 = vmatpush.msk.msra.mxu3 %vm451_vm2, %v404_v44 }
 0x141   : > { %v422_v47 = vpop.f32.mrf.mxu1  ;;  %803 = vmatmul.msk.f32.vlgmr.msra.gmra.mxu3 %vm426_vm3, %v374_v45  ;;  %801 = vmatmul.msk.f32.vlgmr.msrb.gmra.mxu1 %vm426_vm3, %v372_v46 }
 0x142   : > { %v425_v48 = vmax.f32 %v422_v47, 0.0 }
 0x144   : > { %791 = vmatpush.msk.msrb.mxu0 %vm451_vm2, %v425_v48  ;;  %821 = vmatpush.msk.msra.mxu2 %vm451_vm2, %v425_v48 }
 0x145   : > { %794 = vmatmul.msk.f32.vlgmr.msra.gmra.mxu2 %vm426_vm3, %v374_v45  ;;  %792 = vmatmul.msk.f32.vlgmr.msrb.gmra.mxu0 %vm426_vm3, %v372_v46 }
 0x149   : > { %804 = vmatmul.msk.f32.gmra.mxu3 %vm426_vm3, %v375_v49  ;;  %802 = vmatmul.msk.f32.gmra.mxu1 %vm426_vm3, %v373_v50 }
 0x14d   : > { %795 = vmatmul.msk.f32.gmra.mxu2 %vm426_vm3, %v375_v49  ;;  %793 = vmatmul.msk.f32.gmra.mxu0 %vm426_vm3, %v373_v50 }
 0x151   : > { %805 = vmatmul.msk.f32.gmra.mxu3 %vm426_vm3, %v376_v51 }
 0x155   : > { %796 = vmatmul.msk.f32.gmra.mxu2 %vm426_vm3, %v376_v51 }
 0x159   : > { %806 = vmatmul.msk.f32.gmra.mxu3 %vm426_vm3, %v377_v52 }
 0x15d   : > { %797 = vmatmul.msk.f32.gmra.mxu2 %vm426_vm3, %v377_v52 }
 0x161   : > { %807 = vmatmul.msk.f32.gmra.mxu3 %vm426_vm3, %v378_v53 }
 0x165   : > { %798 = vmatmul.msk.f32.gmra.mxu2 %vm426_vm3, %v378_v53 }
 0x169   : > { %808 = vmatmul.msk.f32.gmra.mxu3 %vm426_vm3, %v379_v54 }
 0x16d   : > { %799 = vmatmul.msk.f32.gmra.mxu2 %vm426_vm3, %v379_v54 }
 0x1be   : > { %v516_v55 = vpop.f32.mrf.mxu1 }
 0x1c2   : > { %v472_v56 = vpop.f32.mrf.mxu0 }
 0x1c3   : > { %v517_v57 = vadd.f32 %v516_v55, %v472_v56 }
 0x1c4   : > { %v522_v58 = vpop.f32.mrf.mxu3 }
 0x1c5   : > { %v809_v59 = vmul.f32 -1.442695, %v517_v57 }
 0x1c6   : > { %v519_v61 = vpop.f32.mrf.mxu1 }
 0x1c7   : > { %882 = vpow2.f32 %v809_v59 }
 0x1c8   : > { %v478_v60 = vpop.f32.mrf.mxu2 }
 0x1c9   : > { %v523_v62 = vadd.f32 %v522_v58, %v478_v60 }
 0x1ca   : > { %v475_v63 = vpop.f32.mrf.mxu0 }
 0x1cb   : > { %v811_v0 = vmul.f32 -1.442695, %v523_v62  ;;  %v520_v1 = vadd.f32 %v519_v61, %v475_v63 }
 0x1cc   : > { %v525_v2 = vpop.f32.mrf.mxu3 }
 0x1cd   : > { %v883_v3 = vpop.eup %882  ;;  %884 = vpow2.f32 %v811_v0  ;;  %v810_v4 = vmul.f32 -1.442695, %v520_v1 }
 0x1ce   : > { %v564_v5 = vadd.f32 1.0, %v883_v3 }
 0x1cf   : > { %886 = vpow2.f32 %v810_v4 }
 0x1d0   : > { %v481_v6 = vpop.f32.mrf.mxu2  ;;  %888 = vrcp.f32 %v564_v5  ;;  %vm577_vm4 = vweird.f32 %v564_v5  ;;  %v583_v16 = vand.u32 2147483648, %v564_v5  ;;  %v581_v20 = vand.u32 2147483647, %v564_v5 }
 0x1d1   : > { %v526_v7 = vadd.f32 %v525_v2, %v481_v6 }
 0x1d2   : > { %v584_v27 = vor.u32 1.1754944e-38, %v583_v16  ;;  %vm582_vm7 = vcmp.eq.f32.partialorder %v581_v20, 8.507059e+37 }
 0x1d3   : > { %v885_v8 = vpop.eup %884  ;;  %v812_v9 = vmul.f32 -1.442695, %v526_v7 }
 0x1d4   : > { %v566_v10 = vadd.f32 1.0, %v885_v8  ;;  %v528_v11 = vpop.f32.mrf.mxu3 }
 0x1d5   : > { %v887_v12 = vpop.eup %886  ;;  %890 = vpow2.f32 %v812_v9 }
 0x1d6   : > { %v889_v13 = vpop.eup %888  ;;  %892 = vrcp.f32 %v566_v10  ;;  %v565_v17 = vadd.f32 1.0, %v887_v12  ;;  %v611_v31 = vand.u32 2147483647, %v566_v10  ;;  %v613_v33 = vand.u32 2147483648, %v566_v10 }
 0x1d7   : > { %v573_v14 = vmul.f32 %v889_v13, %v564_v5  ;;  %vm578_vm5 = vweird.f32 %v889_v13  ;;  %vm607_vm9 = vweird.f32 %v566_v10 }
 0x1d8   : > { %v484_v15 = vpop.f32.mrf.mxu2  ;;  %894 = vrcp.f32 %v565_v17  ;;  %vm1182_vm6 = vmor %vm577_vm4, %vm578_vm5  ;;  %vm1196_vm10 = vcmp.eq.f32.partialorder %v611_v31, 8.507059e+37  ;;  %v614_v44 = vor.u32 1.1754944e-38, %v613_v33  ;;  %vm592_vm12 = vweird.f32 %v565_v17 }
 0x1d9   : > { %v529_v18 = vadd.f32 %v528_v11, %v484_v15  ;;  %v574_v19 = vsub.f32 1.0, %v573_v14  ;;  %v596_v49 = vand.u32 2147483647, %v565_v17  ;;  %v598_v50 = vand.u32 2147483648, %v565_v17 }
 0x1db   : > { %v891_v21 = vpop.eup %890  ;;  %v813_v22 = vmul.f32 -1.442695, %v529_v18  ;;  %v575_v23 = vmul.f32 %v889_v13, %v574_v19  ;;  %vm1212_vm15 = vcmp.eq.f32.partialorder %v596_v49, 8.507059e+37  ;;  %v599_v61 = vor.u32 1.1754944e-38, %v598_v50 }
 0x1dc   : > { %v893_v24 = vpop.eup %892  ;;  %v1180_v25 = vadd.f32 1.0, %v891_v21  ;;  %v531_v28 = vpop.f32.mrf.mxu3 }
 0x1dd   : > { %v603_v29 = vmul.f32 %v893_v24, %v566_v10  ;;  %896 = vpow2.f32 %v813_v22  ;;  %v576_v30 = vadd.f32 %v889_v13, %v575_v23  ;;  %vm608_vm8 = vweird.f32 %v893_v24 }
 0x1de   : > { %898 = vrcp.f32 %v1180_v25  ;;  %v895_v35 = vpop.eup %894  ;;  %vm609_vm11 = vmor %vm607_vm9, %vm608_vm8  ;;  %v626_v57 = vand.u32 2147483647, %v1180_v25  ;;  %v628_v58 = vand.u32 2147483648, %v1180_v25  ;;  %vm622_vm2 = vweird.f32 %v1180_v25 }
 0x1df   : > { %v604_v32 = vsub.f32 1.0, %v603_v29  ;;  %v580_v34 = vsel %vm1182_vm6, %v889_v13, %v576_v30  ;;  %v588_v40 = vmul.f32 %v895_v35, %v565_v17  ;;  %vm593_vm13 = vweird.f32 %v895_v35 }
 0x1e0   : > { %v585_v36 = vsel %vm582_vm7, %v584_v27, %v580_v34  ;;  %v487_v37 = vpop.f32.mrf.mxu2  ;;  %vm1208_vm14 = vmor %vm592_vm12, %vm593_vm13  ;;  %v629_v7 = vor.u32 1.1754944e-38, %v628_v58  ;;  %vm627_vm4 = vcmp.eq.f32.partialorder %v626_v57, 8.507059e+37 }
 0x1e1   : > { %v605_v38 = vmul.f32 %v893_v24, %v604_v32  ;;  %692 = vst.msk [vmem:[%s1192_s21] sm:$0xff] %vm214_vm0, %v585_v36  ;;  %v532_v39 = vadd.f32 %v531_v28, %v487_v37  ;;  %v589_v46 = vsub.f32 1.0, %v588_v40 }
 0x1e3   : > { %v897_v42 = vpop.eup %896  ;;  %v606_v43 = vadd.f32 %v893_v24, %v605_v38  ;;  %v814_v45 = vmul.f32 -1.442695, %v532_v39  ;;  %v590_v56 = vmul.f32 %v895_v35, %v589_v46 }
 0x1e4   : > { %v899_v47 = vpop.eup %898  ;;  %v568_v48 = vadd.f32 1.0, %v897_v42  ;;  %v534_v51 = vpop.f32.mrf.mxu3 }
 0x1e5   : > { %v610_v52 = vsel %vm609_vm11, %v893_v24, %v606_v43  ;;  %v618_v53 = vmul.f32 %v899_v47, %v1180_v25  ;;  %900 = vpow2.f32 %v814_v45  ;;  %vm623_vm1 = vweird.f32 %v899_v47 }
 0x1e6   : > { %v615_v54 = vsel %vm1196_vm10, %v614_v44, %v610_v52  ;;  %902 = vrcp.f32 %v568_v48  ;;  %v591_v0 = vadd.f32 %v895_v35, %v590_v56  ;;  %vm624_vm3 = vmor %vm622_vm2, %vm623_vm1  ;;  %v643_v15 = vand.u32 2147483648, %v568_v48 }
 0x1e7   : > { %694 = vst.msk [vmem:[%s1192_s21 + $0x10] sm:$0xff] %vm214_vm0, %v615_v54  ;;  %v619_v55 = vsub.f32 1.0, %v618_v53  ;;  %v641_v18 = vand.u32 2147483647, %v568_v48  ;;  %vm637_vm6 = vweird.f32 %v568_v48 }
 0x1e8   : > { %v490_v62 = vpop.f32.mrf.mxu2  ;;  %v595_v4 = vsel %vm1208_vm14, %v895_v35, %v591_v0  ;;  %v644_v24 = vor.u32 1.1754944e-38, %v643_v15 }
 0x1e9   : > { %v620_v63 = vmul.f32 %v899_v47, %v619_v55  ;;  %v535_v1 = vadd.f32 %v534_v51, %v490_v62  ;;  %v600_v9 = vsel %vm1212_vm15, %v599_v61, %v595_v4  ;;  %vm642_vm8 = vcmp.eq.f32.partialorder %v641_v18, 8.507059e+37 }
 0x1ea   : > { %693 = vst.msk [vmem:[%s1192_s21 + $0x8] sm:$0xff] %vm214_vm0, %v600_v9 }
 0x1eb   : > { %v901_v2 = vpop.eup %900  ;;  %v621_v3 = vadd.f32 %v899_v47, %v620_v63  ;;  %v815_v5 = vmul.f32 -1.442695, %v535_v1 }
 0x1ec   : > { %v903_v6 = vpop.eup %902  ;;  %v569_v8 = vadd.f32 1.0, %v901_v2  ;;  %v537_v13 = vpop.f32.mrf.mxu3 }
 0x1ed   : > { %v625_v10 = vsel %vm624_vm3, %v899_v47, %v621_v3  ;;  %v633_v11 = vmul.f32 %v903_v6, %v568_v48  ;;  %904 = vpow2.f32 %v815_v5  ;;  %vm638_vm5 = vweird.f32 %v903_v6 }
 0x1ee   : > { %v630_v12 = vsel %vm627_vm4, %v629_v7, %v625_v10  ;;  %906 = vrcp.f32 %v569_v8  ;;  %vm639_vm7 = vmor %vm637_vm6, %vm638_vm5  ;;  %v658_v30 = vand.u32 2147483648, %v569_v8  ;;  %v656_v32 = vand.u32 2147483647, %v569_v8 }
 0x1ef   : > { %695 = vst.msk [vmem:[%s1192_s21 + $0x18] sm:$0xff] %vm214_vm0, %v630_v12  ;;  %v634_v14 = vsub.f32 1.0, %v633_v11  ;;  %vm652_vm10 = vweird.f32 %v569_v8 }
 0x1f0   : > { %v493_v16 = vpop.f32.mrf.mxu2  ;;  %v659_v36 = vor.u32 1.1754944e-38, %v658_v30  ;;  %vm657_vm12 = vcmp.eq.f32.partialorder %v656_v32, 8.507059e+37 }
 0x1f1   : > { %v635_v17 = vmul.f32 %v903_v6, %v634_v14  ;;  %v538_v19 = vadd.f32 %v537_v13, %v493_v16 }
 0x1f3   : > { %v905_v20 = vpop.eup %904  ;;  %v636_v21 = vadd.f32 %v903_v6, %v635_v17  ;;  %v816_v22 = vmul.f32 -1.442695, %v538_v19 }
 0x1f4   : > { %v907_v23 = vpop.eup %906  ;;  %v570_v25 = vadd.f32 1.0, %v905_v20 }
 0x1f5   : > { %v640_v26 = vsel %vm639_vm7, %v903_v6, %v636_v21  ;;  %v648_v27 = vmul.f32 %v907_v23, %v569_v8  ;;  %908 = vpow2.f32 %v816_v22  ;;  %vm653_vm9 = vweird.f32 %v907_v23 }
 0x1f6   : > { %v645_v28 = vsel %vm642_vm8, %v644_v24, %v640_v26  ;;  %910 = vrcp.f32 %v570_v25  ;;  %vm654_vm11 = vmor %vm652_vm10, %vm653_vm9  ;;  %v673_v42 = vand.u32 2147483648, %v570_v25  ;;  %v671_v44 = vand.u32 2147483647, %v570_v25 }
 0x1f7   : > { %696 = vst.msk [vmem:[%s1192_s21 + $0x20] sm:$0xff] %vm214_vm0, %v645_v28  ;;  %v649_v29 = vsub.f32 1.0, %v648_v27  ;;  %vm667_vm14 = vweird.f32 %v570_v25 }
 0x1f8   : > { %v674_v47 = vor.u32 1.1754944e-38, %v673_v42  ;;  %vm672_vm1 = vcmp.eq.f32.partialorder %v671_v44, 8.507059e+37 }
 0x1f9   : > { %v650_v31 = vmul.f32 %v907_v23, %v649_v29 }
 0x1fb   : > { %v909_v33 = vpop.eup %908  ;;  %v651_v34 = vadd.f32 %v907_v23, %v650_v31 }
 0x1fc   : > { %v911_v35 = vpop.eup %910  ;;  %v571_v37 = vadd.f32 1.0, %v909_v33 }
 0x1fd   : > { %v655_v38 = vsel %vm654_vm11, %v907_v23, %v651_v34  ;;  %v663_v39 = vmul.f32 %v911_v35, %v570_v25  ;;  %vm668_vm13 = vweird.f32 %v911_v35 }
 0x1fe   : > { %v660_v40 = vsel %vm657_vm12, %v659_v36, %v655_v38  ;;  %912 = vrcp.f32 %v571_v37  ;;  %vm669_vm15 = vmor %vm667_vm14, %vm668_vm13  ;;  %v688_v52 = vand.u32 2147483648, %v571_v37  ;;  %v686_v54 = vand.u32 2147483647, %v571_v37 }
 0x1ff   : > { %697 = vst.msk [vmem:[%s1192_s21 + $0x28] sm:$0xff] %vm214_vm0, %v660_v40  ;;  %v664_v41 = vsub.f32 1.0, %v663_v39  ;;  %vm682_vm3 = vweird.f32 %v571_v37 }
 0x200   : > { %v689_v56 = vor.u32 1.1754944e-38, %v688_v52  ;;  %vm687_vm5 = vcmp.eq.f32.partialorder %v686_v54, 8.507059e+37 }
 0x201   : > { %v665_v43 = vmul.f32 %v911_v35, %v664_v41 }
 0x203   : > { %v666_v45 = vadd.f32 %v911_v35, %v665_v43 }
 0x204   : > { %v913_v46 = vpop.eup %912 }
 0x205   : > { %v670_v48 = vsel %vm669_vm15, %v911_v35, %v666_v45  ;;  %v678_v49 = vmul.f32 %v913_v46, %v571_v37  ;;  %vm683_vm2 = vweird.f32 %v913_v46 }
 0x206   : > { %v675_v50 = vsel %vm672_vm1, %v674_v47, %v670_v48  ;;  %vm684_vm4 = vmor %vm682_vm3, %vm683_vm2 }
 0x207   : > { %698 = vst.msk [vmem:[%s1192_s21 + $0x30] sm:$0xff] %vm214_vm0, %v675_v50  ;;  %v679_v51 = vsub.f32 1.0, %v678_v49 }
 0x209   : > { %v680_v53 = vmul.f32 %v913_v46, %v679_v51 }
 0x20b   : > { %v681_v55 = vadd.f32 %v913_v46, %v680_v53 }
 0x20d   : > { %v685_v57 = vsel %vm684_vm4, %v913_v46, %v681_v55 }
 0x20e   : > { %v690_v58 = vsel %vm687_vm5, %v689_v56, %v685_v57 }
 0x20f   : > { %699 = vst.msk [vmem:[%s1192_s21 + $0x38] sm:$0xff] %vm214_vm0, %v690_v58 }
 0x210 PF: > { %s16_s17 = sadd.s32 1, %s994_s17   ;;  %s1265_s12 = smov %s978_s13 }
 0x211   : > { %p13_p0 = scmp.ge.s32.totalorder %s16_s17, 4   ;;  %s1266_s13 = smov %s982_s14 }
 0x212   : > { %s1267_s14 = smov %s1069_s24  ;;  %s1268_s15 = smov %s990_s16 }
 0x213   : > { %s1269_s16 = smov %s1271_s19  ;;  %15 = sbr.rel (!%p13_p0) target bundleno = 4 (0x4), region = 80 }
 0x218   :  { %721 = vsyncpa [#allocation5], 1 }
 0x219   :  { %723 = vsyncpa [#allocation5 + $0x1], 1 }

</bundles_post_ra>
